<compile_context>
chip_gen: v5e
topology: v5e:2x2
jax: 0.10.0
libtpu: 0.0.40
codegen_flags: <defaults>
</compile_context>

<pallas_src>
import math
from functools import partial

import jax
import jax.numpy as jnp
from jax import lax
from jax.experimental import pallas as pl
from jax.experimental.pallas import tpu as pltpu


def _round_up(x, m):
    return ((x + m - 1) // m) * m


def _linear_kernel(x_ref, w_ref, b_ref, o_ref, acc_ref):
    # x_ref: (tm, tk), w_ref: (tn, tk), b_ref: (1, tn), o_ref: (tm, tn)
    k = pl.program_id(2)

    @pl.when(k == 0)
    def _():
        acc_ref[...] = jnp.zeros_like(acc_ref)

    # Contract on dim 1 of both operands -> no in-kernel transpose / XLU work;
    # MXU matmul with f32 accumulation.
    acc_ref[...] += lax.dot_general(
        x_ref[...],
        w_ref[...],
        dimension_numbers=(((1,), (1,)), ((), ())),
        preferred_element_type=jnp.float32,
    )

    # Bias add + downcast happen once, in the K epilogue.
    @pl.when(k == pl.num_programs(2) - 1)
    def _():
        o_ref[...] = (acc_ref[...] + b_ref[...].astype(jnp.float32)).astype(
            o_ref.dtype
        )


@partial(jax.jit, static_argnames=("compute_dtype",))
def lazily_initialized_linear(x, weight, bias, *, compute_dtype=None):
    """y = x @ weight.T + bias, computed in a tiled Pallas TPU kernel."""
    batch, in_features = x.shape
    out_features, k_dim = weight.shape
    assert k_dim == in_features
    out_dtype = x.dtype

    if compute_dtype is not None:
        # bf16 inputs for MXU peak on v6e/v7x; accumulation stays f32.
        x = x.astype(compute_dtype)
        weight = weight.astype(compute_dtype)

    # Tile sizes: (8,128)-aligned minimums, capped so double-buffered input
    # tiles + f32 accumulator + output tiles stay well under v7x's 64 MiB VMEM.
    tm = min(256, _round_up(batch, 8))
    tn = min(256, _round_up(out_features, 128))  # lane-dense output (>=128)
    tk = min(512, _round_up(in_features, 128))

    m_pad = _round_up(batch, tm)
    n_pad = _round_up(out_features, tn)
    k_pad = _round_up(in_features, tk)

    # Zero padding: padded K contributes 0 to the contraction; padded M/N rows
    # and columns are sliced off after the kernel.
    x_p = jnp.pad(x, ((0, m_pad - batch), (0, k_pad - in_features)))
    w_p = jnp.pad(weight, ((0, n_pad - out_features), (0, k_pad - in_features)))
    b_p = jnp.pad(bias, (0, n_pad - out_features)).reshape(1, n_pad)

    grid = (m_pad // tm, n_pad // tn, k_pad // tk)

    itemsize = jnp.dtype(x_p.dtype).itemsize
    vmem_bytes = (
        2 * (tm * tk + tn * tk) * itemsize         # double-buffered x / W tiles
        + 2 * tn * jnp.dtype(b_p.dtype).itemsize   # bias tile (resident)
        + tm * tn * 4                              # f32 accumulator scratch
        + 2 * tm * tn * jnp.dtype(out_dtype).itemsize  # output double buffer
    )
    vmem_limit = int(min(max(2 * vmem_bytes, 16 << 20), 48 << 20))

    out_p = pl.pallas_call(
        _linear_kernel,
        out_shape=jax.ShapeDtypeStruct((m_pad, n_pad), out_dtype),
        grid=grid,
        in_specs=[
            pl.BlockSpec((tm, tk), lambda i, j, k: (i, k)),
            pl.BlockSpec((tn, tk), lambda i, j, k: (j, k)),
            pl.BlockSpec((1, tn), lambda i, j, k: (0, j)),  # resident across K
        ],
        out_specs=pl.BlockSpec((tm, tn), lambda i, j, k: (i, j)),
        scratch_shapes=[pltpu.VMEM((tm, tn), jnp.float32)],
        compiler_params=pltpu.CompilerParams(
            dimension_semantics=("parallel", "parallel", "arbitrary"),
            vmem_limit_bytes=vmem_limit,
        ),
    )(x_p, w_p, b_p)

    return out_p[:batch, :out_features]


class LazilyInitializedLinearJax:
    """Mirrors the PyTorch module: parameters are created on first call, with
    in_features inferred from x.shape[1]."""

    def __init__(self, out_features, key):
        self.out_features = out_features
        self.weight = None
        self.bias = None
        self._key = key

    def __call__(self, x):
        if self.weight is None:
            in_features = x.shape[1]
            # Deterministic init matching torch.nn.Linear's U(-1/sqrt(in), 1/sqrt(in))
            kw, kb = jax.random.split(self._key)
            bound = 1.0 / math.sqrt(in_features)
            self.weight = jax.random.uniform(
                kw, (self.out_features, in_features),
                minval=-bound, maxval=bound, dtype=jnp.float32)
            self.bias = jax.random.uniform(
                kb, (self.out_features,),
                minval=-bound, maxval=bound, dtype=jnp.float32)
        return lazily_initialized_linear(x, self.weight, self.bias)


if __name__ == "__main__":
    key = jax.random.PRNGKey(0)
    k_x, k_params = jax.random.split(key)

    batch, in_features, out_features = 8, 32, 16
    x = jax.random.normal(k_x, (batch, in_features), dtype=jnp.float32)

    module = LazilyInitializedLinearJax(out_features=out_features, key=k_params)
    y = module(x)
    y = jax.block_until_ready(y)

    # Reference check in plain JAX
    y_ref = x @ module.weight.T + module.bias
    assert y.shape == (batch, out_features)
    assert jnp.allclose(y, y_ref, atol=1e-5, rtol=1e-5)

    print("KERNEL_OK")
</pallas_src>

<mosaic_0001>
module attributes {stable_mosaic.version = 11 : i64} {
  func.func @_linear_kernel(%arg0: i32, %arg1: i32, %arg2: i32, %arg3: memref<8x128xf32, #tpu.memory_space<vmem>>, %arg4: memref<128x128xf32, #tpu.memory_space<vmem>>, %arg5: memref<1x128xf32, #tpu.memory_space<vmem>>, %arg6: memref<8x128xf32, #tpu.memory_space<vmem>>, %arg7: memref<8x128xf32, #tpu.memory_space<vmem>>) attributes {dimension_semantics = [#tpu.dimension_semantics<parallel>, #tpu.dimension_semantics<parallel>, #tpu.dimension_semantics<arbitrary>], iteration_bounds = array<i64: 1, 1, 1>, scalar_prefetch = 0 : i64, scratch_operands = 1 : i64, tpu.core_type = #tpu.core_type<tc>, window_params = [{transform_indices = @transform_0, window_bounds = array<i64: 8, 128>}, {transform_indices = @transform_1, window_bounds = array<i64: 128, 128>}, {transform_indices = @transform_2, window_bounds = array<i64: 1, 128>}, {transform_indices = @transform_3, window_bounds = array<i64: 8, 128>}]} {
    %c0_i32 = arith.constant 0 : i32
    %0 = arith.cmpi eq, %arg2, %c0_i32 : i32
    %1 = arith.extui %0 : i1 to i32
    %c0_i32_0 = arith.constant 0 : i32
    %2 = arith.cmpi ne, %1, %c0_i32_0 : i32
    scf.if %2 {
      %cst_10 = arith.constant 0.000000e+00 : f32
      %12 = vector.broadcast %cst_10 : f32 to vector<8x128xf32>
      %c0_11 = arith.constant 0 : index
      %c0_12 = arith.constant 0 : index
      %13 = vector.load %arg7[%c0_11, %c0_12] : memref<8x128xf32, #tpu.memory_space<vmem>>, vector<8x128xf32>
      tpu.vector_store %arg7[%c0_11, %c0_12], %12 {strides = array<i32>} : memref<8x128xf32, #tpu.memory_space<vmem>>, vector<8x128xf32>,
    } else {
    }
    %c0 = arith.constant 0 : index
    %c0_1 = arith.constant 0 : index
    %3 = vector.load %arg7[%c0, %c0_1] : memref<8x128xf32, #tpu.memory_space<vmem>>, vector<8x128xf32>
    %c0_2 = arith.constant 0 : index
    %c0_3 = arith.constant 0 : index
    %4 = vector.load %arg3[%c0_2, %c0_3] : memref<8x128xf32, #tpu.memory_space<vmem>>, vector<8x128xf32>
    %c0_4 = arith.constant 0 : index
    %c0_5 = arith.constant 0 : index
    %5 = vector.load %arg4[%c0_4, %c0_5] : memref<128x128xf32, #tpu.memory_space<vmem>>, vector<128x128xf32>
    %cst = arith.constant dense<0.000000e+00> : vector<8x128xf32>
    %6 = tpu.matmul %4, %5, %cst {dimension_numbers = #tpu.dot_dimension_numbers<[1], [1], [0], [0], [0, 0, 1, 0], [], []>} : vector<8x128xf32>, vector<128x128xf32>, vector<8x128xf32> -> vector<8x128xf32>
    %7 = arith.addf %3, %6 : vector<8x128xf32>
    %c0_6 = arith.constant 0 : index
    %c0_7 = arith.constant 0 : index
    %8 = vector.load %arg7[%c0_6, %c0_7] : memref<8x128xf32, #tpu.memory_space<vmem>>, vector<8x128xf32>
    tpu.vector_store %arg7[%c0_6, %c0_7], %7 {strides = array<i32>} : memref<8x128xf32, #tpu.memory_space<vmem>>, vector<8x128xf32>,
    %c0_i32_8 = arith.constant 0 : i32
    %9 = arith.cmpi eq, %arg2, %c0_i32_8 : i32
    %10 = arith.extui %9 : i1 to i32
    %c0_i32_9 = arith.constant 0 : i32
    %11 = arith.cmpi ne, %10, %c0_i32_9 : i32
    scf.if %11 {
      %c0_10 = arith.constant 0 : index
      %c0_11 = arith.constant 0 : index
      %12 = vector.load %arg7[%c0_10, %c0_11] : memref<8x128xf32, #tpu.memory_space<vmem>>, vector<8x128xf32>
      %c0_12 = arith.constant 0 : index
      %c0_13 = arith.constant 0 : index
      %13 = vector.load %arg5[%c0_12, %c0_13] : memref<1x128xf32, #tpu.memory_space<vmem>>, vector<1x128xf32>
      %14 = vector.broadcast %13 : vector<1x128xf32> to vector<8x128xf32>
      %15 = arith.addf %12, %14 : vector<8x128xf32>
      %c0_14 = arith.constant 0 : index
      %c0_15 = arith.constant 0 : index
      %16 = vector.load %arg6[%c0_14, %c0_15] : memref<8x128xf32, #tpu.memory_space<vmem>>, vector<8x128xf32>
      tpu.vector_store %arg6[%c0_14, %c0_15], %15 {strides = array<i32>} : memref<8x128xf32, #tpu.memory_space<vmem>>, vector<8x128xf32>,
    } else {
    }
    return
  }
  func.func @transform_0(%arg0: i32, %arg1: i32, %arg2: i32) -> (i32, i32) {
    %c0_i32 = arith.constant 0 : i32
    return %arg0, %arg2 : i32, i32
  }
  func.func @transform_1(%arg0: i32, %arg1: i32, %arg2: i32) -> (i32, i32) {
    %c0_i32 = arith.constant 0 : i32
    return %arg1, %arg2 : i32, i32
  }
  func.func @transform_2(%arg0: i32, %arg1: i32, %arg2: i32) -> (i32, i32) {
    %c0_i32 = arith.constant 0 : i32
    %c0_i32_0 = arith.constant 0 : i32
    return %c0_i32, %arg1 : i32, i32
  }
  func.func @transform_3(%arg0: i32, %arg1: i32, %arg2: i32) -> (i32, i32) {
    %c0_i32 = arith.constant 0 : i32
    return %arg0, %arg1 : i32, i32
  }
}

</mosaic_0001>

<bundles_post_ra>
// kernel: lazily_initialized_linear.1
= control target key start
LH: loop header
LB: loop body
LE: loop exit
PB: predicated region body
PF: predicated region fallthrough
CT: control target
= control target key end

     0   :  { %s192_s0 = inlined_call_operand.vmem [shape: f32[8,128], index: 0, kind: input, shape index: {}]   ;;  %s193_s1 = inlined_call_operand.vmem [shape: f32[128,128], index: 1, kind: input, shape index: {}]   ;;  %s194_s2 = inlined_call_operand.vmem [shape: f32[1,128], index: 2, kind: input, shape index: {}]   ;;  %s195_s3 = inlined_call_operand.hbm [shape: f32[8,128], index: 3, kind: output, shape index: {}]  }
   0x1   :  { %v37_v0 = vld [vmem:[%s193_s1 + $0x78] sm:$0xff]  ;;  %v36_v1 = vld [vmem:[%s193_s1 + $0x70] sm:$0xff] }
   0x2   :  { %38 = vmatpush.xpose.msra.mxu0 %v37_v0 }
   0x3   :  { %8 = vsyncpa [#allocation4], 0  ;;  %v35_v2 = vld [vmem:[%s193_s1 + $0x68] sm:$0xff]  ;;  %v34_v3 = vld [vmem:[%s193_s1 + $0x60] sm:$0xff]  ;;  %s114_s21 = smov [#allocation3]   ;;  %s77_s25 = sshll.u32 %s195_s3, 4  ;;  %s78_s25 = int_to_ptr.hbm [resolvable:$true] %s77_s25 }
   0x4   :  { %v33_v4 = vld [vmem:[%s193_s1 + $0x58] sm:$0xff]  ;;  %v32_v5 = vld [vmem:[%s193_s1 + $0x50] sm:$0xff]  ;;  %v31_v6 = vld [vmem:[%s193_s1 + $0x48] sm:$0xff]  ;;  %s75_s22 = sshll.u32 %s114_s21, 4  ;;  %s76_s22 = int_to_ptr.vmem [resolvable:$true] %s75_s22 }
   0x5   :  { %v30_v7 = vld [vmem:[%s193_s1 + $0x40] sm:$0xff]  ;;  %v29_v8 = vld [vmem:[%s193_s1 + $0x38] sm:$0xff]  ;;  %v28_v9 = vld [vmem:[%s193_s1 + $0x30] sm:$0xff] }
   0x6   :  { %39 = vmatpush.xpose.msra.mxu0 %v36_v1  ;;  %v27_v10 = vld [vmem:[%s193_s1 + $0x28] sm:$0xff]  ;;  %v26_v11 = vld [vmem:[%s193_s1 + $0x20] sm:$0xff]  ;;  %v25_v12 = vld [vmem:[%s193_s1 + $0x18] sm:$0xff] }
   0x7   :  { %v24_v13 = vld [vmem:[%s193_s1 + $0x10] sm:$0xff]  ;;  %v23_v14 = vld [vmem:[%s193_s1 + $0x8] sm:$0xff]  ;;  %v22_v15 = vld [vmem:[%s193_s1] sm:$0xff] }
   0x8   :  { %v21_v16 = vld [vmem:[%s192_s0] sm:$0xff] }
   0x9   :  { %v87_v17 = vld [vmem:[%s194_s2] ss:$0 sm:$0xff] }
   0xa   :  { %40 = vmatpush.xpose.msra.mxu0 %v35_v2 }
   0xe   :  { %41 = vmatpush.xpose.msra.mxu0 %v34_v3 }
  0x12   :  { %42 = vmatpush.xpose.msra.mxu0 %v33_v4 }
  0x16   :  { %43 = vmatpush.xpose.msra.mxu0 %v32_v5 }
  0x1a   :  { %44 = vmatpush.xpose.msra.mxu0 %v31_v6 }
  0x1e   :  { %45 = vmatpush.xpose.msra.mxu0 %v30_v7 }
  0x22   :  { %46 = vmatpush.xpose.msra.mxu0 %v29_v8 }
  0x26   :  { %47 = vmatpush.xpose.msra.mxu0 %v28_v9 }
  0x2a   :  { %48 = vmatpush.xpose.msra.mxu0 %v27_v10 }
  0x2e   :  { %49 = vmatpush.xpose.msra.mxu0 %v26_v11 }
  0x32   :  { %50 = vmatpush.xpose.msra.mxu0 %v25_v12 }
  0x36   :  { %51 = vmatpush.xpose.msra.mxu0 %v24_v13 }
  0x3a   :  { %52 = vmatpush.xpose.msra.mxu0 %v23_v14 }
  0x3e   :  { %53 = vmatpush.xpose.msra.mxu0 %v22_v15 }
  0x41   :  { %54 = vmatmul.f32.vlgmr.msra.gmra.mxu0 %v21_v16 }
  0xbe   :  { %v55_v18 = vpop.f32.mrf.mxu0 }
  0xbf   :  { %v68_v19 = vadd.f32 %v87_v17, %v55_v18 }
  0xc1   :  { %69 = vst [vmem:[#allocation3] sm:$0xff] %v68_v19 }
  0xc2   :  { %80 = dma.vmem_to_hbm [thread:$0]  %s76_s22, 128, %s78_s25, [#allocation4]  }
  0xc3   :  { %112 = dma.done.wait [#allocation4], 128  }
  0xc4   :  { %113 = vsyncadd [#allocation4], 4294967168 }
  0xc5   :  { %85 = vsyncpa [#allocation4], 1 }

</bundles_post_ra>
